<compile_context>
chip_gen: v6e
topology: v6e:2x2x1
jax: 0.10.0
libtpu: 0.0.40
codegen_flags: <defaults>
</compile_context>

<pallas_src>
import jax
import jax.numpy as jnp
from jax import lax
from jax.experimental import pallas as pl
from jax.experimental.pallas import tpu as pltpu


def _sanet_kernel(bias_ref, w1_ref, mw_ref, bw_ref, x_ref, o_ref, lhs_ref):
    # bias_ref: SMEM (2,)               [folded bias1, folded bias2]
    # w1_ref  : VMEM (Cp, 1)            folded 1x1-conv weights (0 on pad rows)
    # mw_ref  : VMEM (Cp, 1)            channel-mean weights (1/C real, 0 pad)
    # bw_ref  : VMEM (3*HW, HW) bf16    7x7 conv (+zero padding) as a matrix
    # x_ref   : VMEM (bt, Cp, HW)       lane-dense images (Cp multiple of 8)
    # o_ref   : VMEM (bt, Cp, HW)
    # lhs_ref : VMEM (bt, 3*HW) bf16    scratch: [max | mean | relu(conv1)]
    HW = o_ref.shape[-1]
    b1 = bias_ref[0]
    b2 = bias_ref[1]

    x = x_ref[...].astype(jnp.float32)                    # (bt, Cp, HW)

    # cbr1 1x1 conv (+folded BN), channel mean and channel max: VPU multiply by
    # a broadcast weight column + XLU sublane reduce (C is tiny -> no MXU pass),
    # fully batched over the tile.  Pad rows carry -1e30 (max-safe) and weight 0.
    w1 = w1_ref[...][None, :, :]                          # (1, Cp, 1)
    mw = mw_ref[...][None, :, :]                          # (1, Cp, 1)
    conv1 = jnp.sum(x * w1, axis=1)                       # (bt, HW)
    ch_mean = jnp.sum(x * mw, axis=1)                     # (bt, HW)
    ch_max = jnp.max(x, axis=1)                           # (bt, HW)
    x1 = jnp.maximum(conv1 + b1, 0.0)                     # ReLU

    # concat([max, mean, x1], dim=1) via direct lane-offset stores into the
    # bf16 scratch (no XLU relayout); offsets are multiples of 128 lanes.
    lhs_ref[:, 0 * HW:1 * HW] = ch_max.astype(lhs_ref.dtype)
    lhs_ref[:, 1 * HW:2 * HW] = ch_mean.astype(lhs_ref.dtype)
    lhs_ref[:, 2 * HW:3 * HW] = x1.astype(lhs_ref.dtype)

    # Whole 7x7 conv (+zero padding), whole batch tile: one bf16 MXU matmul
    # with f32 accumulation.
    s = jnp.dot(lhs_ref[...], bw_ref[...],
                preferred_element_type=jnp.float32)       # (bt, HW)
    scale1 = jax.nn.sigmoid(s + b2) + 1.0                 # cbr2 sigmoid, +1 fold

    # scale * x + x, full-tile (unmasked) lane-dense store.
    o_ref[...] = (x * scale1[:, None, :]).astype(o_ref.dtype)


def _conv7_as_matrix(w2f, H, W):
    """Dense M (3*H*W, H*W) with M[c*H*W + hp*W + wp, h*W + w] =
    w2f[c, hp-h+pad, wp-w+pad] for in-kernel taps (else 0), so that
    x2.reshape(bt, 3*H*W) @ M == conv2d(x2, w2f, padding=pad).reshape(bt, H*W)."""
    K = w2f.shape[-1]
    pad = K // 2
    di = jnp.arange(H)[:, None] - jnp.arange(H)[None, :] + pad      # (Hp, H)
    dj = jnp.arange(W)[:, None] - jnp.arange(W)[None, :] + pad      # (Wp, W)
    mi = (di >= 0) & (di < K)
    mj = (dj >= 0) & (dj < K)
    g = w2f[:, jnp.clip(di, 0, K - 1)[:, :, None, None],
            jnp.clip(dj, 0, K - 1)[None, None, :, :]]               # (3,Hp,H,Wp,W)
    g = g * (mi[:, :, None, None] & mj[None, None, :, :]).astype(w2f.dtype)
    return g.transpose(0, 1, 3, 2, 4).reshape(3 * H * W, H * W)


def sanet_forward(x, w1f, w2f, b1f, b2f, *, batch_tile=None):
    B, C, H, W = x.shape
    HW = H * W
    assert HW % 128 == 0, "H*W must be a multiple of 128 for lane-dense blocks"
    Cp = ((C + 7) // 8) * 8                    # sublane-align each image

    if batch_tile is None:
        # >=2 grid steps when B>=2 (v7x megacore sharding + x/o pipelining)
        # while still packing up to 8 images per step into one MXU matmul.
        batch_tile = max(1, min(8, B // 2)) if B >= 2 else B
        while B % batch_tile:
            batch_tile -= 1
    assert B % batch_tile == 0

    # Channel padding: large-negative so the channel max is unaffected; the
    # 1x1-conv / mean weights are 0 on pad rows so conv1 and mean are exact.
    if Cp != C:
        pad = jnp.full((B, Cp - C, H, W), -1e30, x.dtype)
        xp = jnp.concatenate([x, pad], axis=1)
    else:
        xp = x
    x3 = xp.reshape(B, Cp, HW)                 # lane-dense (last dim = H*W)

    zpad = jnp.zeros((Cp - C,), jnp.float32)
    w1col = jnp.concatenate([w1f.astype(jnp.float32), zpad]).reshape(Cp, 1)
    mwcol = jnp.concatenate(
        [jnp.full((C,), 1.0 / C, jnp.float32), zpad]).reshape(Cp, 1)
    bw = _conv7_as_matrix(w2f.astype(jnp.float32), H, W).astype(jnp.bfloat16)
    bias = jnp.stack([b1f, b2f]).astype(jnp.float32)

    # Explicit VMEM budget: resident bf16 conv matrix (+its spare buffer),
    # double-buffered x/o blocks, scratch, generous headroom; below every
    # generation's scoped limit and v7x's 64 MiB physical ceiling.
    bw_bytes = (3 * HW) * HW * 2
    blk_bytes = batch_tile * Cp * HW * x.dtype.itemsize
    vmem_limit = int(min(48 * 1024 * 1024,
                         2 * bw_bytes + 8 * blk_bytes + 4 * 1024 * 1024))

    out3 = pl.pallas_call(
        _sanet_kernel,
        out_shape=jax.ShapeDtypeStruct((B, Cp, HW), x.dtype),
        grid_spec=pltpu.PrefetchScalarGridSpec(
            num_scalar_prefetch=0,
            grid=(B // batch_tile,),
            in_specs=[
                pl.BlockSpec(memory_space=pltpu.MemorySpace.SMEM),        # biases
                pl.BlockSpec((Cp, 1), lambda i: (0, 0)),                  # 1x1 w
                pl.BlockSpec((Cp, 1), lambda i: (0, 0)),                  # mean w
                pl.BlockSpec((3 * HW, HW), lambda i: (0, 0)),             # conv mat (resident)
                pl.BlockSpec((batch_tile, Cp, HW), lambda i: (i, 0, 0)),  # x
            ],
            out_specs=pl.BlockSpec((batch_tile, Cp, HW), lambda i: (i, 0, 0)),
            scratch_shapes=[pltpu.VMEM((batch_tile, 3 * HW), jnp.bfloat16)],
        ),
        compiler_params=pltpu.CompilerParams(
            # batch axis carries no cross-step state -> shard across v7x's two
            # TensorCores (neutral on v5e/v6e).
            dimension_semantics=("parallel",),
            vmem_limit_bytes=vmem_limit,
        ),
    )(bias, w1col, mwcol, bw, x3)
    return out3[:, :C, :].reshape(B, C, H, W)


def init_params(key, in_channel):
    """Deterministic synthetic params; BN (eval mode, eps=1e-5) folded into convs."""
    k1, k2, k3, k4 = jax.random.split(key, 4)
    # nn.Conv2d(in_channel, 1, 1): weight (1, C, 1, 1), bias (1,)
    w1 = jax.random.normal(k1, (in_channel,), jnp.float32) * 0.5
    b1 = jax.random.normal(k2, (), jnp.float32) * 0.1
    # nn.Conv2d(3, 1, 7, padding=3): weight (1, 3, 7, 7), bias (1,)
    w2 = jax.random.normal(k3, (3, 7, 7), jnp.float32) * 0.2
    b2 = jax.random.normal(k4, (), jnp.float32) * 0.1
    # BatchNorm2d(1) running stats / affine, deterministic non-trivial values
    eps = 1e-5
    g1, beta1, m1, v1 = 1.1, 0.05, 0.02, 0.9
    g2, beta2, m2, v2 = 0.9, -0.03, -0.01, 1.2
    a1 = g1 / jnp.sqrt(v1 + eps)
    a2 = g2 / jnp.sqrt(v2 + eps)
    w1f = (a1 * w1).astype(jnp.float32)
    b1f = jnp.float32(a1 * (b1 - m1) + beta1)
    w2f = (a2 * w2).astype(jnp.float32)
    b2f = jnp.float32(a2 * (b2 - m2) + beta2)
    return w1f, w2f, b1f, b2f


def sanet_reference(x, w1f, b1f, w2f, b2f):
    """Pure-JAX f32 reference of the (BN-folded) forward pass, for validation."""
    conv1 = jnp.einsum('c,bchw->bhw', w1f, x) + b1f
    x1 = jax.nn.relu(conv1)
    ch_max = jnp.max(x, axis=1)
    ch_mean = jnp.mean(x, axis=1)
    x2 = jnp.stack([ch_max, ch_mean, x1], axis=1)            # (B, 3, H, W)
    conv2 = lax.conv_general_dilated(
        x2, w2f[None], window_strides=(1, 1),
        padding=((3, 3), (3, 3)),
        dimension_numbers=('NCHW', 'OIHW', 'NCHW'))[:, 0] + b2f
    scale = jax.nn.sigmoid(conv2)
    return x * scale[:, None] + x


if __name__ == "__main__":
    key = jax.random.PRNGKey(0)
    kx, kp = jax.random.split(key)

    B, C, H, W = 2, 4, 16, 16
    x = jax.random.normal(kx, (B, C, H, W), jnp.float32)
    w1f, w2f, b1f, b2f = init_params(kp, C)

    out = sanet_forward(x, w1f, w2f, b1f, b2f)
    out = jax.block_until_ready(out)

    ref = sanet_reference(x, w1f, b1f, w2f, b2f)
    assert out.shape == x.shape
    err = float(jnp.max(jnp.abs(out - ref)))
    # bf16 conv matrix / lhs feed a sigmoid, so the error is a small relative
    # perturbation of the scale: |out-ref| <~ 1e-2 * |ref|.
    assert jnp.allclose(out, ref, atol=2e-3, rtol=2e-2), f"max abs err {err}"
    print("KERNEL_OK")
</pallas_src>

<mosaic_0001>
module attributes {stable_mosaic.version = 11 : i64} {
  func.func @_sanet_kernel(%arg0: i32, %arg1: memref<2xf32, #tpu.memory_space<smem>>, %arg2: memref<8x1xf32, #tpu.memory_space<vmem>>, %arg3: memref<8x1xf32, #tpu.memory_space<vmem>>, %arg4: memref<768x256xbf16, #tpu.memory_space<vmem>>, %arg5: memref<1x8x256xf32, #tpu.memory_space<vmem>>, %arg6: memref<1x8x256xf32, #tpu.memory_space<vmem>>, %arg7: memref<1x768xbf16, #tpu.memory_space<vmem>>) attributes {dimension_semantics = [#tpu.dimension_semantics<parallel>], iteration_bounds = array<i64: 2>, scalar_prefetch = 0 : i64, scratch_operands = 1 : i64, tpu.core_type = #tpu.core_type<tc>, window_params = [{transform_indices = @transform_0, window_bounds = array<i64: 2>}, {pipeline_mode = #tpu.pipeline_mode<synchronous>, transform_indices = @transform_1, window_bounds = array<i64: 8, 1>}, {pipeline_mode = #tpu.pipeline_mode<synchronous>, transform_indices = @transform_2, window_bounds = array<i64: 8, 1>}, {pipeline_mode = #tpu.pipeline_mode<synchronous>, transform_indices = @transform_3, window_bounds = array<i64: 768, 256>}, {transform_indices = @transform_4, window_bounds = array<i64: 1, 8, 256>}, {transform_indices = @transform_5, window_bounds = array<i64: 1, 8, 256>}]} {
    %c0 = arith.constant 0 : index
    %0 = memref.load %arg1[%c0] : memref<2xf32, #tpu.memory_space<smem>>
    %c1 = arith.constant 1 : index
    %1 = memref.load %arg1[%c1] : memref<2xf32, #tpu.memory_space<smem>>
    %c0_0 = arith.constant 0 : index
    %c0_1 = arith.constant 0 : index
    %c0_2 = arith.constant 0 : index
    %2 = vector.load %arg5[%c0_0, %c0_1, %c0_2] : memref<1x8x256xf32, #tpu.memory_space<vmem>>, vector<1x8x256xf32>
    %c0_3 = arith.constant 0 : index
    %c0_4 = arith.constant 0 : index
    %3 = vector.load %arg2[%c0_3, %c0_4] : memref<8x1xf32, #tpu.memory_space<vmem>>, vector<8x1xf32>
    %4 = vector.shape_cast %3 : vector<8x1xf32> to vector<1x8x1xf32>
    %c0_5 = arith.constant 0 : index
    %c0_6 = arith.constant 0 : index
    %5 = vector.load %arg3[%c0_5, %c0_6] : memref<8x1xf32, #tpu.memory_space<vmem>>, vector<8x1xf32>
    %6 = vector.shape_cast %5 : vector<8x1xf32> to vector<1x8x1xf32>
    %7 = vector.broadcast %4 : vector<1x8x1xf32> to vector<1x8x256xf32>
    %8 = arith.mulf %2, %7 : vector<1x8x256xf32>
    %cst = arith.constant dense<0.000000e+00> : vector<1x256xf32>
    %9 = vector.multi_reduction <add>, %8, %cst [1] : vector<1x8x256xf32> to vector<1x256xf32>
    %10 = vector.broadcast %6 : vector<1x8x1xf32> to vector<1x8x256xf32>
    %11 = arith.mulf %2, %10 : vector<1x8x256xf32>
    %cst_7 = arith.constant dense<0.000000e+00> : vector<1x256xf32>
    %12 = vector.multi_reduction <add>, %11, %cst_7 [1] : vector<1x8x256xf32> to vector<1x256xf32>
    %cst_8 = arith.constant dense<0xFF800000> : vector<1x256xf32>
    %13 = vector.multi_reduction <maximumf>, %2, %cst_8 [1] : vector<1x8x256xf32> to vector<1x256xf32>
    %14 = vector.broadcast %0 : f32 to vector<1x256xf32>
    %15 = arith.addf %9, %14 : vector<1x256xf32>
    %cst_9 = arith.constant 0.000000e+00 : f32
    %16 = vector.broadcast %cst_9 : f32 to vector<1x256xf32>
    %17 = arith.maximumf %15, %16 : vector<1x256xf32>
    %18 = arith.truncf %13 : vector<1x256xf32> to vector<1x256xbf16>
    %c0_10 = arith.constant 0 : index
    %c0_11 = arith.constant 0 : index
    %19 = vector.load %arg7[%c0_10, %c0_11] : memref<1x768xbf16, #tpu.memory_space<vmem>>, vector<1x256xbf16>
    tpu.vector_store %arg7[%c0_10, %c0_11], %18 {strides = array<i32>} : memref<1x768xbf16, #tpu.memory_space<vmem>>, vector<1x256xbf16>,
    %20 = arith.truncf %12 : vector<1x256xf32> to vector<1x256xbf16>
    %c0_12 = arith.constant 0 : index
    %c256 = arith.constant 256 : index
    %21 = vector.load %arg7[%c0_12, %c256] : memref<1x768xbf16, #tpu.memory_space<vmem>>, vector<1x256xbf16>
    tpu.vector_store %arg7[%c0_12, %c256], %20 {strides = array<i32>} : memref<1x768xbf16, #tpu.memory_space<vmem>>, vector<1x256xbf16>,
    %22 = arith.truncf %17 : vector<1x256xf32> to vector<1x256xbf16>
    %c0_13 = arith.constant 0 : index
    %c512 = arith.constant 512 : index
    %23 = vector.load %arg7[%c0_13, %c512] : memref<1x768xbf16, #tpu.memory_space<vmem>>, vector<1x256xbf16>
    tpu.vector_store %arg7[%c0_13, %c512], %22 {strides = array<i32>} : memref<1x768xbf16, #tpu.memory_space<vmem>>, vector<1x256xbf16>,
    %c0_14 = arith.constant 0 : index
    %c0_15 = arith.constant 0 : index
    %24 = vector.load %arg7[%c0_14, %c0_15] : memref<1x768xbf16, #tpu.memory_space<vmem>>, vector<1x768xbf16>
    %c0_16 = arith.constant 0 : index
    %c0_17 = arith.constant 0 : index
    %25 = vector.load %arg4[%c0_16, %c0_17] : memref<768x256xbf16, #tpu.memory_space<vmem>>, vector<768x256xbf16>
    %cst_18 = arith.constant dense<0.000000e+00> : vector<1x256xf32>
    %26 = tpu.matmul %24, %25, %cst_18 {dimension_numbers = #tpu.dot_dimension_numbers<[1], [0], [0], [1], [0, 0, 1, 1], [], []>} : vector<1x768xbf16>, vector<768x256xbf16>, vector<1x256xf32> -> vector<1x256xf32>
    %27 = vector.broadcast %1 : f32 to vector<1x256xf32>
    %28 = arith.addf %26, %27 : vector<1x256xf32>
    %29 = arith.negf %28 : vector<1x256xf32>
    %30 = math.exp %29 : vector<1x256xf32>
    %cst_19 = arith.constant 1.000000e+00 : f32
    %31 = vector.broadcast %cst_19 : f32 to vector<1x256xf32>
    %32 = arith.addf %31, %30 : vector<1x256xf32>
    %33 = arith.divf %31, %32 : vector<1x256xf32>
    %cst_20 = arith.constant 1.000000e+00 : f32
    %34 = vector.broadcast %cst_20 : f32 to vector<1x256xf32>
    %35 = arith.addf %33, %34 : vector<1x256xf32>
    %36 = vector.shape_cast %35 : vector<1x256xf32> to vector<1x1x256xf32>
    %37 = vector.broadcast %36 : vector<1x1x256xf32> to vector<1x8x256xf32>
    %38 = arith.mulf %2, %37 : vector<1x8x256xf32>
    %c0_21 = arith.constant 0 : index
    %c0_22 = arith.constant 0 : index
    %c0_23 = arith.constant 0 : index
    %39 = vector.load %arg6[%c0_21, %c0_22, %c0_23] : memref<1x8x256xf32, #tpu.memory_space<vmem>>, vector<1x8x256xf32>
    tpu.vector_store %arg6[%c0_21, %c0_22, %c0_23], %38 {strides = array<i32>} : memref<1x8x256xf32, #tpu.memory_space<vmem>>, vector<1x8x256xf32>,
    return
  }
  func.func @transform_0(%arg0: i32) -> i32 {
    %c0_i32 = arith.constant 0 : i32
    %c0_i32_0 = arith.constant 0 : i32
    return %c0_i32 : i32
  }
  func.func @transform_1(%arg0: i32) -> (i32, i32) {
    %c0_i32 = arith.constant 0 : i32
    %c0_i32_0 = arith.constant 0 : i32
    %c0_i32_1 = arith.constant 0 : i32
    return %c0_i32, %c0_i32_0 : i32, i32
  }
  func.func @transform_2(%arg0: i32) -> (i32, i32) {
    %c0_i32 = arith.constant 0 : i32
    %c0_i32_0 = arith.constant 0 : i32
    %c0_i32_1 = arith.constant 0 : i32
    return %c0_i32, %c0_i32_0 : i32, i32
  }
  func.func @transform_3(%arg0: i32) -> (i32, i32) {
    %c0_i32 = arith.constant 0 : i32
    %c0_i32_0 = arith.constant 0 : i32
    %c0_i32_1 = arith.constant 0 : i32
    return %c0_i32, %c0_i32_0 : i32, i32
  }
  func.func @transform_4(%arg0: i32) -> (i32, i32, i32) {
    %c0_i32 = arith.constant 0 : i32
    %c0_i32_0 = arith.constant 0 : i32
    %c0_i32_1 = arith.constant 0 : i32
    return %arg0, %c0_i32, %c0_i32_0 : i32, i32, i32
  }
  func.func @transform_5(%arg0: i32) -> (i32, i32, i32) {
    %c0_i32 = arith.constant 0 : i32
    %c0_i32_0 = arith.constant 0 : i32
    %c0_i32_1 = arith.constant 0 : i32
    return %arg0, %c0_i32, %c0_i32_0 : i32, i32, i32
  }
}

</mosaic_0001>

<bundles_post_ra>
// kernel: tpu_custom_call.1
= control target key start
LH: loop header
LB: loop body
LE: loop exit
PB: predicated region body
PF: predicated region fallthrough
CT: control target
= control target key end

     0   :  { %10 = vsyncpa [#allocation6], 0  ;;  %s2055_s0 = inlined_call_operand.vmem [shape: f32[2], index: 0, kind: input, shape index: {}]   ;;  %s2056_s1 = inlined_call_operand.vmem [shape: f32[8,1], index: 1, kind: input, shape index: {}]   ;;  %s2057_s2 = inlined_call_operand.vmem [shape: f32[8,1], index: 2, kind: input, shape index: {}]   ;;  %s2058_s3 = inlined_call_operand.hbm [shape: bf16[768,256], index: 3, kind: input, shape index: {}]   ;;  %s2059_s4 = inlined_call_operand.hbm [shape: f32[2,8,256], index: 4, kind: input, shape index: {}]   ;;  %s2060_s5 = inlined_call_operand.hbm [shape: f32[2,8,256], index: 5, kind: output, shape index: {}]  }
   0x1   :  { %11 = vsyncpa [#allocation4], 0 }
   0x2   :  { %12 = vsyncpa [#allocation9], 0 }
   0x3   :  { %14 = vsyncpa [#allocation9 + $0x1], 0 }
   0x4   :  { %15 = vsyncpa [#allocation5], 0 }
   0x5   :  { %17 = vsyncpa [#allocation5 + $0x1], 0  ;;  %s1825_s18 = smov 0   ;;  %s1827_s19 = smov 0  }
   0x6   :  { %s1829_s20 = smov 0   ;;  %s1831_s21 = smov 0  }
   0x7 LB: > { %s1846_s22 = sadd.s32 4294967295, %s1785_s21   ;;  %s1297_s23 = sadd.s32 4294967294, %s1785_s21   ;;  %s1785_s21 = sphi %s1831_s21, %s2088_s21   ;;  %s1781_s20 = sphi %s1829_s20, %s2087_s20   ;;  %s1777_s19 = sphi %s1827_s19, %s2086_s19   ;;  %s1773_s18 = sphi %s1825_s18, %s2085_s18  }
   0x8   : > { %p127_p0 = scmp.ne.s32.totalorder %s1777_s19, %s1773_s18  ;;  %p2061_p1 = scmp.eq.s32.totalorder %s1846_s22, 0 }
   0x9   : > { %p157_p3 = scmp.eq.s32.totalorder %s1297_s23, 1  ;;  %p1298_p5 = scmp.ge.s32.totalorder %s1785_s21, 1 }
   0xa   : > { %p1855_p4 = por %p2061_p1, %p127_p0  ;;  %p164_p7 = scmp.lt.s32.totalorder %s1785_s21, 3 }
   0xb   : > { %p1860_p6 = por %p157_p3, %p127_p0  ;;  %s177_s28 = sshll.u32 %s2055_s0, 4  ;;  %s178_s28 = int_to_ptr.vmem [resolvable:$true] %s177_s28 }
   0xc   : > { %s2065_s24 = scalar_select %p1855_p4, 1, 0 }
   0xd   : > { %s2066_s25 = scalar_select %p1860_p6, 1, 0 }
   0xe   : > { %p1868_p8 = pnand %p1298_p5, %p164_p7  ;;  %s1787_s30 = smov [#allocation7]  }
   0xf   : > { %s193_s6 = sshll.u32 %s1787_s30, 4  ;;  %s1644_s8 = scalar_lea.vmem %s178_s28, 16  ;;  %s194_s6 = int_to_ptr.vmem [resolvable:$true] %s193_s6 }
  0x10   : > { %s2067_s29 = scalar_select %p1868_p8, 1, 0 }
  0x11   : > { %p1431_p10 = pneg %p1868_p8  ;;  %p1645_p12 = scmp.ne.s32.totalorder %s178_s28, %s1644_s8 }
  0x12   : > { %p1652_p5 = scmp.lt.s32.totalorder %s178_s28, %s178_s28  ;;  %p1653_p7 = scmp.lt.s32.totalorder %s1644_s8, %s1644_s8 }
  0x13   : > { %p1877_p11 = pnand %p1431_p10, %p2061_p1 }
  0x14   : > { %p1654_p9 = por %p1653_p7, %p1652_p5 }
  0x15   : > { %p1646_p13 = pneg %p1877_p11 }
  0x17   : > { %p1647_p0 = pnand %p1646_p13, %p1645_p12 }
  0x19   : > { %p1648_p3 = pneg %p1647_p0 }
  0x1b   : > { %p1655_p2 = pnand %p1654_p9, %p1648_p3 }
  0x1d   : > { %1658 = shalt.err (!%p1655_p2)
}
  0x1e   : > { %s1788_s9 = smov [#allocation3]   ;;  %s1670_s10 = scalar_lea.vmem %s194_s6, 12288 }
  0x1f   : > { %1434 = dma.vmem_to_smem (!%p1877_p11), %s178_s28, 16, %s1788_s9, [#allocation6]  }
  0x20   : > { %p1671_p10 = scmp.ne.s32.totalorder %s194_s6, %s1670_s10  ;;  %p1678_p4 = scmp.lt.s32.totalorder %s194_s6, %s194_s6 }
  0x21   : > { %p1679_p8 = scmp.lt.s32.totalorder %s1670_s10, %s1670_s10 }
  0x22   : > { %p1673_p1 = pnand %p1671_p10, %p1646_p13 }
  0x23   : > { %p1680_p12 = por %p1679_p8, %p1678_p4 }
  0x24   : > { %p1674_p6 = pneg %p1673_p1 }
  0x26   : > { %p1681_p0 = pnand %p1680_p12, %p1674_p6 }
  0x28   : > { %1684 = shalt.err (!%p1681_p0)
}
  0x29   : > { %s1789_s11 = smov 128   ;;  %s1790_s12 = smov 8  }
  0x2a   : > { %1437 = dma.hbm_to_vmem [thread:$0]  (!%p1877_p11), %s2058_s3, 12288, %s194_s6, [#allocation4], %s1789_s11, %s1789_s11, %s1790_s12  }
  0x2b   : > { %s1891_s15 = sadd.s32 1, %s1785_s21   ;;  %s114_s16 = sadd.s32 1, %s1781_s20 }
  0x2c   : > { %s111_s17 = ssub.s32 %s1785_s21, %s1891_s15  ;;  %p121_p1 = scmp.ne.s32.totalorder %s1781_s20, %s1777_s19 }
  0x2d   : > { %p112_p2 = scmp.eq.s32.totalorder %s111_s17, 0  ;;  %p122_p4 = scmp.eq.s32.totalorder %s1785_s21, 0 }
  0x2e   : > { %p2069_p6 = scmp.eq.s32.totalorder %s1846_s22, 1  ;;  %p1448_p9 = scmp.lt.s32.totalorder %s1785_s21, 2 }
  0x2f   : > { %s1907_s26 = scalar_select %p112_p2, %s1781_s20, %s114_s16  }
  0x30   : > { %p1901_p8 = por %p2069_p6, %p121_p1  ;;  %p123_p13 = por %p122_p4, %p121_p1 }
  0x31   : > { %s207_s27 = sand.u32 1, %s1781_s20   ;;  %s1417_s30 = sshll.u32 %s1785_s21, 8 }
  0x32   : > { %s2070_s23 = scalar_select %p1901_p8, 1, 0 }
  0x33   : > { %s1302_s28 = sshll.u32 %s207_s27, 4  ;;  %s1914_s8 = scalar_lea.hbm %s2059_s4, %s1417_s30 }
  0x34   : > { %s211_s9 = scalar_lea.vmem [#allocation8], %s1302_s28  ;;  %p1916_p11 = pnand %p1448_p9, %p123_p13 }
  0x35   : > { %s219_s10 = sshll.u32 %s211_s9, 4  ;;  %s208_s12 = scalar_lea.sflag [#allocation9], %s207_s27  ;;  %s220_s10 = int_to_ptr.vmem [resolvable:$true] %s219_s10 }
  0x36   : > { %s1685_s13 = scalar_lea.hbm %s1914_s8, 256  ;;  %p1687_p5 = pneg %p1916_p11 }
  0x37   : > { %p1686_p3 = scmp.ne.s32.totalorder %s1914_s8, %s1685_s13  ;;  %s1690_s17 = scalar_lea.hbm %s2059_s4, 512 }
  0x38   : > { %p1691_p12 = scmp.lt.s32.totalorder %s1914_s8, %s2059_s4  ;;  %p1692_p0 = scmp.lt.s32.totalorder %s1690_s17, %s1685_s13 }
  0x39   : > { %p1688_p7 = pnand %p1687_p5, %p1686_p3 }
  0x3a   : > { %p1693_p1 = por %p1692_p0, %p1691_p12 }
  0x3b   : > { %p1689_p10 = pneg %p1688_p7 }
  0x3d   : > { %p1694_p2 = pnand %p1693_p1, %p1689_p10 }
  0x3f   : > { %1697 = shalt.err (!%p1694_p2)
}
  0x40   : > { %s1698_s6 = scalar_lea.vmem %s220_s10, 256  ;;  %s1791_s27 = smov [#allocation8]  }
  0x41   : > { %p1699_p4 = scmp.ne.s32.totalorder %s220_s10, %s1698_s6  ;;  %s1703_s7 = sshll.u32 %s1791_s27, 4  ;;  %s1704_s7 = int_to_ptr.vmem [resolvable:$false] %s1703_s7 }
  0x42   : > { %s1705_s9 = scalar_lea.vmem %s1704_s7, 512  ;;  %p1706_p13 = scmp.lt.s32.totalorder %s220_s10, %s1704_s7 }
  0x43   : > { %p1701_p6 = pnand %p1699_p4, %p1687_p5  ;;  %p1707_p3 = scmp.lt.s32.totalorder %s1705_s9, %s1698_s6 }
  0x45   : > { %p1702_p9 = pneg %p1701_p6  ;;  %p1708_p7 = por %p1707_p3, %p1706_p13 }
  0x47   : > { %p1709_p8 = pnand %p1708_p7, %p1702_p9 }
  0x49   : > { %1712 = shalt.err (!%p1709_p8)
}
  0x4a   : > { %1441 = dma.hbm_to_vmem [thread:$0]  (!%p1916_p11), %s1914_s8, 256, %s220_s10, %s208_s12  }
  0x4b   : > { %p2072_p10 = scmp.ne.s32.totalorder %s2067_s29, 0 }
  0x4c   : > { %p2073_p12 = scmp.eq.s32.totalorder (!%p2072_p10), %s1846_s22, 0 }
  0x4d   : > { %228 = sbr.rel (%p2072_p10) target bundleno = 571 (0x23b), region = 40 }
  0x52   : > { %1756 = dma.done.wait (%p2073_p12), [#allocation6], 16   ;;  %p2074_p5 = pmov %p2073_p12 }
  0x54   : > { %1758 = vsyncadd (%p2074_p5), [#allocation6], 4294967280  ;;  %p2075_p0 = pmov %p2074_p5 }
  0x56   : > { %1760 = dma.done.wait (%p2075_p0), [#allocation4], 12288   ;;  %p2076_p1 = pmov %p2075_p0 }
  0x57   : > { %s1945_s11 = sand.u32 1, %s1777_s19   ;;  %p2077_p8 = scmp.ne.s32.totalorder %s2065_s24, 0 }
  0x58   : > { %1762 = vsyncadd (%p2076_p1), [#allocation4], 4294955008  ;;  %s1308_s29 = sshll.u32 %s1945_s11, 4  ;;  %s239_s8 = scalar_lea.sflag [#allocation9], %s1945_s11 }
  0x59   : > { %s1951_s10 = scalar_lea.vmem [#allocation8], %s1308_s29 }
  0x5a   : > { %1764 = dma.done.wait (%p2077_p8), %s239_s8, 256  }
  0x5b   : > { %1766 = vsyncadd (%p2077_p8), %s239_s8, 4294967040 }
  0x5c   : > { %247 = sfence }
  0x5d   : > { %v274_v0 = vld [vmem:[%s2056_s1] sm:$0xff]  ;;  %v1792_v1 = vmov 0   ;;  %v1496_v6 = vld [vmem:[#allocation7 + $0x64] ss:$8 sps:$4 sm:$0xff]   ;;  %v339_v30 = vlaneseq  ;;  %v1793_v33 = vmov 1966171168  }
  0x5e   : > { %1490 = vset.pattern.permute.xlu0 %v1792_v1  ;;  %v275_v2 = vld [vmem:[%s2057_s2] sm:$0xff]  ;;  %v1500_v9 = vld [vmem:[#allocation7 + $0x164] ss:$8 sps:$4 sm:$0xff]   ;;  %v337_v34 = vunpack.c.l.s4 %v1793_v33  ;;  %vm351_vm0 = vcmask 1040384   ;;  %vm352_vm1 = vsmask.f32 256 }
  0x5f   : > { %v1491_v3 = vld [vmem:[#allocation7 + $0x74] ss:$8 sps:$4 sm:$0xff]   ;;  %v1493_v4 = vld [vmem:[#allocation7 + $0x70] ss:$8 sps:$4 sm:$0xff]   ;;  %278 = vperm.xlu0 %1490, %v274_v0   ;;  %v1499_v8 = vld [vmem:[#allocation7 + $0x60] ss:$8 sps:$4 sm:$0xff]  }
  0x60   : > { %v1494_v5 = vld [vmem:[#allocation7 + $0x174] ss:$8 sps:$4 sm:$0xff]   ;;  %1039 = vmatprep.subr.bf16.mxu0 %v1491_v3  ;;  %v1498_v7 = vld [vmem:[#allocation7 + $0x170] ss:$8 sps:$4 sm:$0xff]   ;;  %v1504_v11 = vld [vmem:[#allocation7 + $0x160] ss:$8 sps:$4 sm:$0xff]   ;;  %v338_v43 = vunpack.c.0.s8 %v337_v34 }
  0x61   : > { %1040 = vmatpush1.bf16.msra.mxu0 %v1493_v4  ;;  %1080 = vmatprep.subr.bf16.mxu1 %v1494_v5  ;;  %v1502_v10 = vld [vmem:[#allocation7 + $0x54] ss:$8 sps:$4 sm:$0xff]   ;;  %v1505_v12 = vld [vmem:[#allocation7 + $0x50] ss:$8 sps:$4 sm:$0xff]   ;;  %v1508_v14 = vld [vmem:[#allocation7 + $0x44] ss:$8 sps:$4 sm:$0xff]  }
  0x62   : > { %1041 = vmatprep.subr.bf16.mxu0 %v1496_v6  ;;  %1081 = vmatpush1.bf16.msra.mxu1 %v1498_v7  ;;  %v1506_v13 = vld [vmem:[#allocation7 + $0x154] ss:$8 sps:$4 sm:$0xff]   ;;  %v1510_v15 = vld [vmem:[#allocation7 + $0x150] ss:$8 sps:$4 sm:$0xff]   ;;  %v1512_v16 = vld [vmem:[#allocation7 + $0x144] ss:$8 sps:$4 sm:$0xff]  }
  0x63   : > { %297 = vperm.xlu0 %1490, %v275_v2   ;;  %1082 = vmatprep.subr.bf16.mxu1 %v1500_v9  ;;  %v1511_v17 = vld [vmem:[#allocation7 + $0x40] ss:$8 sps:$4 sm:$0xff]   ;;  %v1514_v18 = vld [vmem:[#allocation7 + $0x34] ss:$8 sps:$4 sm:$0xff]   ;;  %v1517_v21 = vld [vmem:[#allocation7 + $0x30] ss:$8 sps:$4 sm:$0xff]  }
  0x64   : > { %v1516_v19 = vld [vmem:[#allocation7 + $0x140] ss:$8 sps:$4 sm:$0xff]   ;;  %v1518_v20 = vld [vmem:[#allocation7 + $0x134] ss:$8 sps:$4 sm:$0xff]   ;;  %v1520_v22 = vld [vmem:[#allocation7 + $0x24] ss:$8 sps:$4 sm:$0xff]  }
  0x65   : > { %1042 = vmatpush1.bf16.msra.mxu0 %v1499_v8  ;;  %v1964_v23 = vld [vmem:[%s1951_s10] sm:$0xff]  ;;  %v1967_v25 = vld [vmem:[%s1951_s10 + $0x8] sm:$0xff]  ;;  %v1973_v40 = vshrl.u32 %v339_v30, 7  ;;  %vm1975_vm2 = vmand %vm351_vm0, %vm352_vm1  ;;  %vm354_vm3 = vcmask 1041409   ;;  %vm355_vm4 = vsmask.f32 1280 }
  0x66   : > { %1043 = vmatprep.subr.bf16.mxu0 %v1502_v10  ;;  %1083 = vmatpush1.bf16.msra.mxu1 %v1504_v11  ;;  %v1522_v24 = vld [vmem:[#allocation7 + $0x130] ss:$8 sps:$4 sm:$0xff]   ;;  %v314_v26 = vrot.slane %v1964_v23, 4  ;;  %v1524_v27 = vld [vmem:[#allocation7 + $0x124] ss:$8 sps:$4 sm:$0xff]   ;;  %v320_v28 = vrot.slane %v1967_v25, 4  ;;  %vm356_vm5 = vmand %vm354_vm3, %vm355_vm4 }
  0x67   : > { %1084 = vmatprep.subr.bf16.mxu1 %v1506_v13  ;;  %v1523_v29 = vld [vmem:[#allocation7 + $0x20] ss:$8 sps:$4 sm:$0xff]   ;;  %v1526_v32 = vld [vmem:[#allocation7 + $0x14] ss:$8 sps:$4 sm:$0xff]   ;;  %v1529_v42 = vld [vmem:[#allocation7 + $0x10] ss:$8 sps:$4 sm:$0xff]   ;;  %v1980_v53 = vsub.s32 %v338_v43, %v1973_v40 }
  0x68   : > { %v315_v31 = vmax.f32 %v1964_v23, %v314_v26  ;;  %v321_v35 = vmax.f32 %v1967_v25, %v320_v28  ;;  %v1528_v36 = vld [vmem:[#allocation7 + $0x120] ss:$8 sps:$4 sm:$0xff]   ;;  %v1530_v39 = vld [vmem:[#allocation7 + $0x114] ss:$8 sps:$4 sm:$0xff]   ;;  %v1532_v45 = vld [vmem:[#allocation7 + $0x4] ss:$8 sps:$4 sm:$0xff]  }
  0x69   : > { %1044 = vmatpush1.bf16.msra.mxu0 %v1505_v12  ;;  %v1534_v47 = vld [vmem:[#allocation7 + $0x110] ss:$8 sps:$4 sm:$0xff]   ;;  %v1536_v49 = vld [vmem:[#allocation7 + $0x104] ss:$8 sps:$4 sm:$0xff]   ;;  %v1535_v52 = vld [vmem:[#allocation7] ss:$8 sps:$4 sm:$0xff]  }
  0x6a   : > { %1045 = vmatprep.subr.bf16.mxu0 %v1508_v14  ;;  %1085 = vmatpush1.bf16.msra.mxu1 %v1510_v15  ;;  %v316_v37 = vrot.slane %v315_v31, 2  ;;  %v322_v38 = vrot.slane %v321_v35, 2  ;;  %v1538_v55 = vld [vmem:[#allocation7 + $0xf4] ss:$8 sps:$4 sm:$0xff]   ;;  %v1540_v56 = vld [vmem:[#allocation7 + $0x100] ss:$8 sps:$4 sm:$0xff]   ;;  %vm1985_vm6 = vmor %vm356_vm5, %vm1975_vm2 }
  0x6b   : > { %1086 = vmatprep.subr.bf16.mxu1 %v1512_v16  ;;  %v1542_v58 = vld [vmem:[#allocation7 + $0x1f4] ss:$8 sps:$4 sm:$0xff]   ;;  %v358_v59 = vld [vmem:[#allocation2] sm:$0x3]  ;;  %v1544_v62 = vld [vmem:[#allocation7 + $0xe4] ss:$8 sps:$4 sm:$0xff]  }
  0x6c   : > { %v317_v41 = vmax.f32 %v315_v31, %v316_v37  ;;  %v323_v44 = vmax.f32 %v321_v35, %v322_v38  ;;  %v1541_v60 = vld [vmem:[#allocation7 + $0xf0] ss:$8 sps:$4 sm:$0xff]   ;;  %v1548_v2 = vld [vmem:[#allocation7 + $0x1e4] ss:$8 sps:$4 sm:$0xff]   ;;  %v1547_v3 = vld [vmem:[#allocation7 + $0xe0] ss:$8 sps:$4 sm:$0xff]  }
  0x6d   : > { %1046 = vmatpush1.bf16.msra.mxu0 %v1511_v17  ;;  %v1546_v0 = vld [vmem:[#allocation7 + $0x1f0] ss:$8 sps:$4 sm:$0xff]   ;;  %v1550_v5 = vld [vmem:[#allocation7 + $0xd4] ss:$8 sps:$4 sm:$0xff]   ;;  %v1552_v6 = vld [vmem:[#allocation7 + $0x1e0] ss:$8 sps:$4 sm:$0xff]  }
  0x6e   : > { %1047 = vmatprep.subr.bf16.mxu0 %v1514_v18  ;;  %1087 = vmatpush1.bf16.msra.mxu1 %v1516_v19  ;;  %v318_v46 = vrot.slane %v317_v41, 1  ;;  %v324_v48 = vrot.slane %v323_v44, 1  ;;  %v1554_v7 = vld [vmem:[#allocation7 + $0x1d4] ss:$8 sps:$4 sm:$0xff]   ;;  %v1553_v8 = vld [vmem:[#allocation7 + $0xd0] ss:$8 sps:$4 sm:$0xff]  }
  0x6f   : > { %1088 = vmatprep.subr.bf16.mxu1 %v1518_v20  ;;  %v1556_v9 = vld [vmem:[#allocation7 + $0xc4] ss:$8 sps:$4 sm:$0xff]   ;;  %v1558_v10 = vld [vmem:[#allocation7 + $0x1d0] ss:$8 sps:$4 sm:$0xff]   ;;  %v1559_v12 = vld [vmem:[#allocation7 + $0xc0] ss:$8 sps:$4 sm:$0xff]  }
  0x70   : > { %v319_v50 = vmax.f32 %v317_v41, %v318_v46  ;;  %v325_v54 = vmax.f32 %v323_v44, %v324_v48  ;;  %v1560_v11 = vld [vmem:[#allocation7 + $0x1c4] ss:$8 sps:$4 sm:$0xff]   ;;  %v1562_v13 = vld [vmem:[#allocation7 + $0xb4] ss:$8 sps:$4 sm:$0xff]   ;;  %v1564_v14 = vld [vmem:[#allocation7 + $0x1c0] ss:$8 sps:$4 sm:$0xff]  }
  0x71   : > { %1048 = vmatpush1.bf16.msra.mxu0 %v1517_v21  ;;  %v1566_v15 = vld [vmem:[#allocation7 + $0x1b4] ss:$8 sps:$4 sm:$0xff]   ;;  %v1565_v16 = vld [vmem:[#allocation7 + $0xb0] ss:$8 sps:$4 sm:$0xff]   ;;  %v1568_v17 = vld [vmem:[#allocation7 + $0xa4] ss:$8 sps:$4 sm:$0xff]  }
  0x72   : > { %1049 = vmatprep.subr.bf16.mxu0 %v1520_v22  ;;  %1089 = vmatpush1.bf16.msra.mxu1 %v1522_v24  ;;  %v1311_v57 = vpack.c.bf16 %v325_v54, %v319_v50  ;;  %v1570_v18 = vld [vmem:[#allocation7 + $0x1b0] ss:$8 sps:$4 sm:$0xff]   ;;  %v1571_v19 = vld [vmem:[#allocation7 + $0xa0] ss:$8 sps:$4 sm:$0xff]   ;;  %v1572_v20 = vld [vmem:[#allocation7 + $0x1a4] ss:$8 sps:$4 sm:$0xff]  }
  0x73   : > { %1090 = vmatprep.subr.bf16.mxu1 %v1524_v27  ;;  %v1574_v21 = vld [vmem:[#allocation7 + $0x94] ss:$8 sps:$4 sm:$0xff]   ;;  %v1576_v22 = vld [vmem:[#allocation7 + $0x1a0] ss:$8 sps:$4 sm:$0xff]   ;;  %v1577_v24 = vld [vmem:[#allocation7 + $0x90] ss:$8 sps:$4 sm:$0xff]  }
  0x74   : > { %v342_v61 = vrot.slane %v1311_v57, %v1980_v53  ;;  %v1578_v26 = vld [vmem:[#allocation7 + $0x194] ss:$8 sps:$4 sm:$0xff]   ;;  %v1580_v27 = vld [vmem:[#allocation7 + $0x84] ss:$8 sps:$4 sm:$0xff]   ;;  %v1582_v28 = vld [vmem:[#allocation7 + $0x190] ss:$8 sps:$4 sm:$0xff]  }
  0x75   : > { %1050 = vmatpush1.bf16.msra.mxu0 %v1523_v29  ;;  %v1583_v29 = vld [vmem:[#allocation7 + $0x80] ss:$8 sps:$4 sm:$0xff]   ;;  %v1584_v30 = vld [vmem:[#allocation7 + $0x184] ss:$8 sps:$4 sm:$0xff]   ;;  %v1590_v31 = vld [vmem:[#allocation7 + $0x274] ss:$8 sps:$4 sm:$0xff]  }
  0x76   : > { %1051 = vmatprep.subr.bf16.mxu0 %v1526_v32  ;;  %1091 = vmatpush1.bf16.msra.mxu1 %v1528_v36  ;;  %v349_v1 = vrot.slane %v342_v61, %v1980_v53  ;;  %v1587_v32 = vld [vmem:[#allocation7 + $0x180] ss:$8 sps:$4 sm:$0xff]   ;;  %s270_s24 = sld [smem:[#allocation3]]  ;;  %s1418_s30 = sshll.u32 %s1846_s22, 8 }
  0x77   : > { %1092 = vmatprep.subr.bf16.mxu1 %v1530_v39  ;;  %s1310_s17 = sld [smem:[#allocation3 + $0x1]]  ;;  %s269_s28 = scalar_lea.vmem [#allocation10], %s1308_s29 }
  0x78   : > { %v359_v4 = vsel %vm1985_vm6, %v349_v1, %v358_v59  ;;  %s1203_s6 = sshll.u32 %s269_s28, 4  ;;  %s1201_s9 = scalar_lea.hbm %s2060_s5, %s1418_s30  ;;  %s1204_s6 = int_to_ptr.vmem [resolvable:$true] %s1203_s6 }
  0x79   : > { %1052 = vmatpush1.bf16.msra.mxu0 %v1529_v42  ;;  %360 = vst [vmem:[#allocation2] sm:$0x3] %v359_v4  ;;  %s1189_s8 = scalar_lea.sflag [#allocation5], %s1945_s11  ;;  %s1713_s10 = scalar_lea.vmem %s1204_s6, 256 }
  0x7a   : > { %1053 = vmatprep.subr.bf16.mxu0 %v1532_v45  ;;  %1093 = vmatpush1.bf16.msra.mxu1 %v1534_v47  ;;  %p1714_p11 = scmp.ne.s32.totalorder %s1204_s6, %s1713_s10  ;;  %p2082_p2 = scmp.ne.s32.totalorder %s2070_s23, 0 }
  0x7b   : > { %1094 = vmatprep.subr.bf16.mxu1 %v1536_v49  ;;  %s1794_s22 = smov [#allocation10]  }
  0x7c   : > { %v326_v57 = vstv %s270_s24  ;;  %p1715_p4 = pnand %p1714_p11, %p2082_p2  ;;  %s1717_s29 = sshll.u32 %s1794_s22, 4  ;;  %s1718_s29 = int_to_ptr.vmem [resolvable:$false] %s1717_s29 }
  0x7d   : > { %1054 = vmatpush1.bf16.msra.mxu0 %v1535_v52  ;;  %s1719_s12 = scalar_lea.vmem %s1718_s29, 512  ;;  %p1720_p9 = scmp.lt.s32.totalorder %s1204_s6, %s1718_s29 }
  0x7e   : > { %1055 = vmatprep.subr.bf16.mxu0 %v1538_v55  ;;  %1095 = vmatpush1.bf16.msra.mxu1 %v1540_v56  ;;  %p1716_p6 = pneg %p1715_p4  ;;  %p1721_p13 = scmp.lt.s32.totalorder %s1719_s12, %s1713_s10 }
  0x7f   : > { %1096 = vmatprep.subr.bf16.mxu1 %v1542_v58 }
  0x80   : > { %p1722_p3 = por %p1721_p13, %p1720_p9 }
  0x81   : > { %1056 = vmatpush2.bf16.msra.mxu0 %v1541_v60 }
  0x82   : > { %1057 = vmatprep.subr.bf16.mxu0 %v1544_v62  ;;  %1097 = vmatpush2.bf16.msra.mxu1 %v1546_v0  ;;  %p1723_p7 = pnand %p1722_p3, %p1716_p6 }
  0x83   : > { %1098 = vmatprep.subr.bf16.mxu1 %v1548_v2 }
  0x85   : > { %1058 = vmatpush2.bf16.msra.mxu0 %v1547_v3 }
  0x86   : > { %1059 = vmatprep.subr.bf16.mxu0 %v1550_v5  ;;  %1099 = vmatpush2.bf16.msra.mxu1 %v1552_v6 }
  0x87   : > { %1100 = vmatprep.subr.bf16.mxu1 %v1554_v7 }
  0x89   : > { %1060 = vmatpush2.bf16.msra.mxu0 %v1553_v8 }
  0x8a   : > { %1061 = vmatprep.subr.bf16.mxu0 %v1556_v9  ;;  %1101 = vmatpush2.bf16.msra.mxu1 %v1558_v10 }
  0x8b   : > { %1102 = vmatprep.subr.bf16.mxu1 %v1560_v11  ;;  %v381_v11 = vld [vmem:[#allocation2 + $0x2] sm:$0x3] }
  0x8d   : > { %1062 = vmatpush2.bf16.msra.mxu0 %v1559_v12  ;;  %v404_v12 = vld [vmem:[#allocation2 + $0x4] sm:$0x3] }
  0x8e   : > { %1063 = vmatprep.subr.bf16.mxu0 %v1562_v13  ;;  %1103 = vmatpush2.bf16.msra.mxu1 %v1564_v14 }
  0x8f   : > { %1104 = vmatprep.subr.bf16.mxu1 %v1566_v15 }
  0x91   : > { %1064 = vmatpush2.bf16.msra.mxu0 %v1565_v16 }
  0x92   : > { %1065 = vmatprep.subr.bf16.mxu0 %v1568_v17  ;;  %1105 = vmatpush2.bf16.msra.mxu1 %v1570_v18 }
  0x93   : > { %1106 = vmatprep.subr.bf16.mxu1 %v1572_v20 }
  0x95   : > { %1066 = vmatpush2.bf16.msra.mxu0 %v1571_v19 }
  0x96   : > { %1067 = vmatprep.subr.bf16.mxu0 %v1574_v21  ;;  %1107 = vmatpush2.bf16.msra.mxu1 %v1576_v22 }
  0x97   : > { %1108 = vmatprep.subr.bf16.mxu1 %v1578_v26  ;;  %v1588_v26 = vld [vmem:[#allocation7 + $0x270] ss:$8 sps:$4 sm:$0xff]  }
  0x99   : > { %1068 = vmatpush2.bf16.msra.mxu0 %v1577_v24 }
  0x9a   : > { %1069 = vmatprep.subr.bf16.mxu0 %v1580_v27  ;;  %1109 = vmatpush2.bf16.msra.mxu1 %v1582_v28 }
  0x9b   : > { %1110 = vmatprep.subr.bf16.mxu1 %v1584_v30 }
  0x9d   : > { %1070 = vmatpush2.bf16.msra.mxu0 %v1583_v29  ;;  %v1593_v29 = vld [vmem:[#allocation7 + $0x264] ss:$8 sps:$4 sm:$0xff]  }
  0x9e   : > { %1121 = vmatprep.subr.bf16.mxu0 %v1590_v31  ;;  %1111 = vmatpush2.bf16.msra.mxu1 %v1587_v32  ;;  %v1591_v31 = vld [vmem:[#allocation7 + $0x260] ss:$8 sps:$4 sm:$0xff]   ;;  %v1596_v32 = vld [vmem:[#allocation7 + $0x254] ss:$8 sps:$4 sm:$0xff]  }
  0xda   : > { %v279_v33 = vpop.permute.xlu0 %278 }
  0xdb   : > { %v281_v34 = vmul.f32 %v279_v33, %v1964_v23  ;;  %v282_v35 = vmul.f32 %v279_v33, %v1967_v25  ;;  %v1594_v33 = vld [vmem:[#allocation7 + $0x250] ss:$8 sps:$4 sm:$0xff]  }
  0xdd   : > { %v283_v36 = vrot.slane %v281_v34, 4  ;;  %v289_v37 = vrot.slane %v282_v35, 4 }
  0xde   : > { %v298_v38 = vpop.permute.xlu0 %297 }
  0xdf   : > { %v284_v39 = vadd.f32 %v283_v36, %v281_v34  ;;  %v290_v41 = vadd.f32 %v289_v37, %v282_v35  ;;  %v300_v42 = vmul.f32 %v298_v38, %v1964_v23  ;;  %v301_v43 = vmul.f32 %v298_v38, %v1967_v25  ;;  %v1599_v34 = vld [vmem:[#allocation7 + $0x244] ss:$8 sps:$4 sm:$0xff]   ;;  %v1597_v35 = vld [vmem:[#allocation7 + $0x240] ss:$8 sps:$4 sm:$0xff]   ;;  %v1602_v36 = vld [vmem:[#allocation7 + $0x234] ss:$8 sps:$4 sm:$0xff]  }
  0xe0   : > { %v1600_v37 = vld [vmem:[#allocation7 + $0x230] ss:$8 sps:$4 sm:$0xff]   ;;  %v1605_v38 = vld [vmem:[#allocation7 + $0x224] ss:$8 sps:$4 sm:$0xff]  }
  0xe1   : > { %v285_v44 = vrot.slane %v284_v39, 2  ;;  %v291_v45 = vrot.slane %v290_v41, 2  ;;  %v302_v46 = vrot.slane %v300_v42, 4  ;;  %v308_v47 = vrot.slane %v301_v43, 4 }
  0xe3   : > { %v286_v48 = vadd.f32 %v285_v44, %v284_v39  ;;  %v292_v49 = vadd.f32 %v291_v45, %v290_v41  ;;  %v303_v50 = vadd.f32 %v302_v46, %v300_v42  ;;  %v309_v51 = vadd.f32 %v308_v47, %v301_v43  ;;  %v1603_v39 = vld [vmem:[#allocation7 + $0x220] ss:$8 sps:$4 sm:$0xff]   ;;  %v1608_v41 = vld [vmem:[#allocation7 + $0x214] ss:$8 sps:$4 sm:$0xff]   ;;  %v1606_v42 = vld [vmem:[#allocation7 + $0x210] ss:$8 sps:$4 sm:$0xff]  }
  0xe4   : > { %v1611_v43 = vld [vmem:[#allocation7 + $0x204] ss:$8 sps:$4 sm:$0xff]   ;;  %v1609_v44 = vld [vmem:[#allocation7 + $0x200] ss:$8 sps:$4 sm:$0xff]   ;;  %v1614_v45 = vld [vmem:[#allocation7 + $0x2f4] ss:$8 sps:$4 sm:$0xff]  }
  0xe5   : > { %v287_v52 = vrot.slane %v286_v48, 1  ;;  %v293_v54 = vrot.slane %v292_v49, 1  ;;  %v304_v55 = vrot.slane %v303_v50, 2  ;;  %v310_v56 = vrot.slane %v309_v51, 2  ;;  %v1612_v46 = vld [vmem:[#allocation7 + $0x2f0] ss:$8 sps:$4 sm:$0xff]  }
  0xe6   : > { %v1617_v47 = vld [vmem:[#allocation7 + $0x2e4] ss:$8 sps:$4 sm:$0xff]  }
  0xe7   : > { %v288_v58 = vadd.f32 %v287_v52, %v286_v48  ;;  %v294_v59 = vadd.f32 %v293_v54, %v292_v49  ;;  %v305_v60 = vadd.f32 %v304_v55, %v303_v50  ;;  %v311_v61 = vadd.f32 %v310_v56, %v309_v51  ;;  %v1615_v48 = vld [vmem:[#allocation7 + $0x2e0] ss:$8 sps:$4 sm:$0xff]   ;;  %v1620_v49 = vld [vmem:[#allocation7 + $0x2d4] ss:$8 sps:$4 sm:$0xff]   ;;  %v1618_v50 = vld [vmem:[#allocation7 + $0x2d0] ss:$8 sps:$4 sm:$0xff]  }
  0xe8   : > { %v1623_v51 = vld [vmem:[#allocation7 + $0x2c4] ss:$8 sps:$4 sm:$0xff]   ;;  %v1621_v52 = vld [vmem:[#allocation7 + $0x2c0] ss:$8 sps:$4 sm:$0xff]   ;;  %v1626_v54 = vld [vmem:[#allocation7 + $0x2b4] ss:$8 sps:$4 sm:$0xff]  }
  0xe9   : > { %v327_v62 = vadd.f32 %v326_v57, %v288_v58  ;;  %v328_v0 = vadd.f32 %v326_v57, %v294_v59  ;;  %v306_v1 = vrot.slane %v305_v60, 1  ;;  %v312_v2 = vrot.slane %v311_v61, 1  ;;  %v1624_v55 = vld [vmem:[#allocation7 + $0x2b0] ss:$8 sps:$4 sm:$0xff]   ;;  %v1629_v56 = vld [vmem:[#allocation7 + $0x2a4] ss:$8 sps:$4 sm:$0xff]  }
  0xea   : > { %v1627_v57 = vld [vmem:[#allocation7 + $0x2a0] ss:$8 sps:$4 sm:$0xff]   ;;  %v1632_v58 = vld [vmem:[#allocation7 + $0x294] ss:$8 sps:$4 sm:$0xff]   ;;  %v1630_v59 = vld [vmem:[#allocation7 + $0x290] ss:$8 sps:$4 sm:$0xff]  }
  0xeb   : > { %v329_v3 = vmax.f32 %v327_v62, 0.0  ;;  %v330_v4 = vmax.f32 %v328_v0, 0.0  ;;  %v307_v5 = vadd.f32 %v306_v1, %v305_v60  ;;  %v313_v6 = vadd.f32 %v312_v2, %v311_v61  ;;  %v1635_v60 = vld [vmem:[#allocation7 + $0x284] ss:$8 sps:$4 sm:$0xff]   ;;  %v1633_v61 = vld [vmem:[#allocation7 + $0x280] ss:$8 sps:$4 sm:$0xff]  }
  0xed   : > { %v1313_v7 = vpack.c.bf16 %v330_v4, %v329_v3  ;;  %v1312_v8 = vpack.c.bf16 %v313_v6, %v307_v5 }
  0xef   : > { %v395_v9 = vrot.slane %v1313_v7, %v1980_v53  ;;  %v372_v10 = vrot.slane %v1312_v8, %v1980_v53  ;;  %v504_v8 = vstv %s1310_s17 }
  0xf1   : > { %v402_v13 = vrot.slane %v395_v9, %v1980_v53  ;;  %v379_v14 = vrot.slane %v372_v10, %v1980_v53 }
  0xf3   : > { %v382_v15 = vsel %vm1985_vm6, %v379_v14, %v381_v11  ;;  %v405_v16 = vsel %vm1985_vm6, %v402_v13, %v404_v12 }
  0xf4   : > { %383 = vst [vmem:[#allocation2 + $0x2] sm:$0x3] %v382_v15  ;;  %406 = vst [vmem:[#allocation2 + $0x4] sm:$0x3] %v405_v16 }
  0xfb   : > { %v407_v17 = vld [vmem:[#allocation2] sm:$0x3f] }
  0xfc   : > { %v506_v18 = vcombine.high %v407_v17, %v407_v17  ;;  %v513_v19 = vrot.slane %v407_v17, %v1980_v53 }
  0xfe   : > { %v521_v20 = vcombine.high %v513_v19, %v513_v19  ;;  %v2006_v21 = vrot.slane %v506_v18, %v1980_v53  ;;  %v529_v22 = vrot.slane %v513_v19, %v1980_v53 }
 0x100   : > { %v543_v24 = vrot.slane %v521_v20, %v1980_v53  ;;  %v522_v27 = vcombine.high %v2006_v21, %v2006_v21  ;;  %v551_v30 = vcombine.high %v529_v22, %v529_v22  ;;  %v536_v62 = vrot.slane %v2006_v21, %v1980_v53 }
 0x102   : > { %1071 = vmatprep.mubr.bf16.mxu0 %v543_v24  ;;  %v552_v63 = vcombine.high %v543_v24, %v543_v24  ;;  %v550_v28 = vrot.slane %v522_v27, %v1980_v53 }
 0x103   : > { %1072 = vmatmul.mubr.bf16.vlgmr.msra.gmra.mxu0 %v529_v22 }
 0x104   : > { %1122 = vmatpush1.bf16.msra.mxu0 %v1588_v26  ;;  %1112 = vmatprep.mubr.bf16.mxu1 %v552_v63  ;;  %v1178_v26 = vsub.s32 0, %v1973_v40 }
 0x105   : > { %1153 = vmatprep.mubr.bf16.mxu0 %v550_v28  ;;  %1113 = vmatmul.mubr.bf16.vlgmr.msra.gmra.mxu1 %v551_v30 }
 0x106   : > { %1123 = vmatprep.subr.bf16.mxu0 %v1593_v29 }
 0x108   : > { %1124 = vmatpush1.bf16.msra.mxu0 %v1591_v31 }
 0x109   : > { %1125 = vmatprep.subr.bf16.mxu0 %v1596_v32 }
 0x10c   : > { %1126 = vmatpush1.bf16.msra.mxu0 %v1594_v33 }
 0x10d   : > { %1127 = vmatprep.subr.bf16.mxu0 %v1599_v34 }
 0x110   : > { %1128 = vmatpush1.bf16.msra.mxu0 %v1597_v35 }
 0x111   : > { %1129 = vmatprep.subr.bf16.mxu0 %v1602_v36 }
 0x114   : > { %1130 = vmatpush1.bf16.msra.mxu0 %v1600_v37 }
 0x115   : > { %1131 = vmatprep.subr.bf16.mxu0 %v1605_v38 }
 0x118   : > { %1132 = vmatpush1.bf16.msra.mxu0 %v1603_v39 }
 0x119   : > { %1133 = vmatprep.subr.bf16.mxu0 %v1608_v41 }
 0x11c   : > { %1134 = vmatpush1.bf16.msra.mxu0 %v1606_v42 }
 0x11d   : > { %1135 = vmatprep.subr.bf16.mxu0 %v1611_v43 }
 0x120   : > { %1136 = vmatpush1.bf16.msra.mxu0 %v1609_v44 }
 0x121   : > { %1137 = vmatprep.subr.bf16.mxu0 %v1614_v45 }
 0x124   : > { %1138 = vmatpush2.bf16.msra.mxu0 %v1612_v46 }
 0x125   : > { %1139 = vmatprep.subr.bf16.mxu0 %v1617_v47 }
 0x128   : > { %1140 = vmatpush2.bf16.msra.mxu0 %v1615_v48 }
 0x129   : > { %1141 = vmatprep.subr.bf16.mxu0 %v1620_v49 }
 0x12c   : > { %1142 = vmatpush2.bf16.msra.mxu0 %v1618_v50 }
 0x12d   : > { %1143 = vmatprep.subr.bf16.mxu0 %v1623_v51 }
 0x130   : > { %1144 = vmatpush2.bf16.msra.mxu0 %v1621_v52 }
 0x131   : > { %1145 = vmatprep.subr.bf16.mxu0 %v1626_v54 }
 0x134   : > { %1146 = vmatpush2.bf16.msra.mxu0 %v1624_v55 }
 0x135   : > { %1147 = vmatprep.subr.bf16.mxu0 %v1629_v56 }
 0x138   : > { %1148 = vmatpush2.bf16.msra.mxu0 %v1627_v57 }
 0x139   : > { %1149 = vmatprep.subr.bf16.mxu0 %v1632_v58 }
 0x13c   : > { %1150 = vmatpush2.bf16.msra.mxu0 %v1630_v59 }
 0x13d   : > { %1151 = vmatprep.subr.bf16.mxu0 %v1635_v60 }
 0x140   : > { %1152 = vmatpush2.bf16.msra.mxu0 %v1633_v61 }
 0x143   : > { %1154 = vmatmul.mubr.bf16.vlgmr.msra.gmra.mxu0 %v536_v62 }
 0x1c3   : > { %v1073_v0 = vpop.f32.mrf.mxu0 }
 0x1c4   : > { %v1074_v9 = vadd.f32 %v1073_v0, %v504_v8 }
 0x1c5   : > { %v1075_v1 = vpop.f32.mrf.mxu0  ;;  %v1114_v2 = vpop.f32.mrf.mxu1 }
 0x1c6   : > { %v1076_v10 = vadd.f32 %v1075_v1, %v504_v8  ;;  %v1115_v11 = vadd.f32 %v1114_v2, %v1074_v9 }
 0x1c7   : > { %v1077_v3 = vpop.f32.mrf.mxu0  ;;  %v1116_v4 = vpop.f32.mrf.mxu1 }
 0x1c8   : > { %v1117_v13 = vadd.f32 %v1116_v4, %v1076_v10 }
 0x1c9   : > { %v1078_v5 = vpop.f32.mrf.mxu0  ;;  %v1118_v6 = vpop.f32.mrf.mxu1 }
 0x1cb   : > { %v1119_v7 = vpop.f32.mrf.mxu1 }
 0x203   : > { %v1155_v12 = vpop.f32.mrf.mxu0 }
 0x204   : > { %v1156_v14 = vadd.f32 %v1155_v12, %v1115_v11 }
 0x205   : > { %v1157_v15 = vpop.f32.mrf.mxu0 }
 0x206   : > { %v1410_v16 = vmul.f32 -1.442695, %v1156_v14  ;;  %v1158_v53 = vadd.f32 %v1157_v15, %v1117_v13 }
 0x207   : > { %v1159_v17 = vpop.f32.mrf.mxu0 }
 0x208   : > { %1636 = vpow2.f32 %v1410_v16  ;;  %v1411_v18 = vmul.f32 -1.442695, %v1158_v53 }
 0x209   : > { %v1160_v19 = vpop.f32.mrf.mxu0 }
 0x20a   : > { %1638 = vpow2.f32 %v1411_v18 }
 0x215   : > { %v1637_v20 = vpop.eup %1636 }
 0x216   : > { %v1168_v21 = vadd.f32 1.0, %v1637_v20 }
 0x217   : > { %v1639_v22 = vpop.eup %1638 }
 0x218   : > { %1640 = vrcp.f32 %v1168_v21  ;;  %v1169_v24 = vadd.f32 1.0, %v1639_v22 }
 0x21a   : > { %1642 = vrcp.f32 %v1169_v24 }
 0x225   : > { %v1641_v27 = vpop.eup %1640 }
 0x226   : > { %v1174_v63 = vadd.f32 1.0, %v1641_v27 }
 0x227   : > { %v1643_v28 = vpop.eup %1642 }
 0x228   : > { %v1175_v29 = vadd.f32 1.0, %v1643_v28  ;;  %v1179_v30 = vrot.slane %v1174_v63, %v1178_v26 }
 0x22a   : > { %v1183_v31 = vrot.slane %v1175_v29, %v1178_v26  ;;  %v1184_v32 = vmul.f32 %v1179_v30, %v1964_v23 }
 0x22c   : > { %v1185_v33 = vmul.f32 %v1183_v31, %v1967_v25  ;;  %1186 = vst [vmem:[%s269_s28] sm:$0xff] %v1184_v32 }
 0x22e   : > { %1187 = vst [vmem:[%s269_s28 + $0x8] sm:$0xff] %v1185_v33 }
 0x22f   : > { %1726 = shalt.err (!%p1723_p7)
}
 0x230   : > { %s1727_s13 = scalar_lea.hbm %s1201_s9, 256  ;;  %s1731_s16 = scalar_lea.hbm %s2060_s5, 512 }
 0x231   : > { %p1728_p10 = scmp.ne.s32.totalorder %s1201_s9, %s1727_s13  ;;  %p1732_p0 = scmp.lt.s32.totalorder %s1201_s9, %s2060_s5 }
 0x232   : > { %p1733_p1 = scmp.lt.s32.totalorder %s1731_s16, %s1727_s13 }
 0x233   : > { %p1729_p12 = pnand %p1728_p10, %p2082_p2 }
 0x234   : > { %p1734_p8 = por %p1733_p1, %p1732_p0 }
 0x235   : > { %p1730_p5 = pneg %p1729_p12 }
 0x237   : > { %p1735_p11 = pnand %p1734_p8, %p1730_p5 }
 0x239   : > { %1738 = shalt.err (!%p1735_p11)
}
 0x23a   : > { %1429 = dma.vmem_to_hbm [thread:$0]  (%p2082_p2), %s1204_s6, 256, %s1201_s9, %s1189_s8  }
 0x23b PF: > { %s1215_s30 = sand.u32 1, %s1773_s18   ;;  %p2083_p4 = scmp.ne.s32.totalorder %s2066_s25, 0 }
 0x23c   : > { %p2084_p6 = scmp.ge.s32.totalorder %s1785_s21, 2  ;;  %s1216_s28 = scalar_lea.sflag [#allocation5], %s1215_s30 }
 0x23e   : > { %p1443_p9 = pnand %p2084_p6, %p2083_p4 }
 0x240   : > { %p1444_p13 = pneg %p1443_p9 }
 0x242   : > { %1768 = dma.done.wait (%p1444_p13), %s1216_s28, 256  }
 0x243   : > { %1770 = vsyncadd (%p1444_p13), %s1216_s28, 4294967040  ;;  %p20_p3 = scmp.ge.s32.totalorder %s1891_s15, 4   ;;  %s2085_s18 = smov %s1777_s19 }
 0x244   : > { %s2086_s19 = smov %s1781_s20  ;;  %s2087_s20 = smov %s1907_s26 }
 0x245   : > { %s2088_s21 = smov %s1891_s15  ;;  %22 = sbr.rel (!%p20_p3) target bundleno = 7 (0x7), region = 95 }
 0x24a   :  { %1221 = vsyncpa [#allocation4], 1 }
 0x24b   :  { %1223 = vsyncpa [#allocation4 + $0x1], 1 }
 0x24c   :  { %1224 = vsyncpa [#allocation9], 1 }
 0x24d   :  { %1226 = vsyncpa [#allocation9 + $0x1], 1 }
 0x24e   :  { %1227 = vsyncpa [#allocation5], 1 }
 0x24f   :  { %1229 = vsyncpa [#allocation5 + $0x1], 1 }
 0x250   :  { %1230 = vsyncpa [#allocation6], 1 }
 0x251   :  { %1232 = vsyncpa [#allocation6 + $0x1], 1 }

</bundles_post_ra>
